<compile_context>
chip_gen: v7x
topology: tpu7x:2x2x1
jax: 0.10.0
libtpu: 0.0.40
codegen_flags: <defaults>
</compile_context>

<pallas_src>
import jax
import jax.numpy as jnp
from jax.experimental import pallas as pl
from jax.experimental.pallas import tpu as pltpu

# ---- module hyperparameters (from the PyTorch source) ----
N_EMBD = 64
HIDDEN = 4 * N_EMBD   # 256
DROPOUT = 0.0         # nn.Dropout(p=0.0) == identity
# TODO(synk): implement pltpu.prng_seed/prng_random_bits-based masking if DROPOUT > 0.
assert DROPOUT == 0.0, "kernel implements the p=0.0 (identity) dropout only"

# Folded ("row-pair") sizes: two logical rows per lane-row -> 128-lane-dense I/O.
C2 = 2 * N_EMBD       # 128
H2 = 2 * HIDDEN       # 512


def _round_up(a: int, b: int) -> int:
    return ((a + b - 1) // b) * b


def _ffwd_kernel(x_ref, w1_ref, b1_ref, w2_ref, b2_ref, o_ref):
    # x_ref: (tm, 128) folded rows; weights are 2x2 block-diagonal copies so the
    # two logical rows packed into each lane-row are processed independently.
    x = x_ref[...]

    # Linear 1 + bias + ReLU: (tm, 128) @ (128, 512) -> (tm, 512), f32 accumulation.
    h = jnp.dot(x, w1_ref[...], preferred_element_type=jnp.float32)
    h = jnp.maximum(h + b1_ref[...].astype(jnp.float32), 0.0)
    # Narrow hidden back to the I/O dtype before the second MXU pass
    # (no-op for f32; halves its VMEM footprint and doubles MXU rate for bf16).
    h = h.astype(x_ref.dtype)

    # Linear 2 + bias: (tm, 512) @ (512, 128) -> (tm, 128), f32 accumulation.
    out = jnp.dot(h, w2_ref[...], preferred_element_type=jnp.float32)
    out = out + b2_ref[...].astype(jnp.float32)

    # Dropout(p=0.0) is the identity -> nothing to do.
    o_ref[...] = out.astype(o_ref.dtype)


def _block_diag2(w):
    """[[w, 0], [0, w]] -- lets one folded lane-row carry two logical rows."""
    r, c = w.shape
    z = jnp.zeros((r, c), w.dtype)
    top = jnp.concatenate([w, z], axis=1)
    bot = jnp.concatenate([z, w], axis=1)
    return jnp.concatenate([top, bot], axis=0)


def feed_forward(x, w1, b1, w2, b2, *, row_block=2048):
    """x: (B, T, C). w1: (C, 4C). b1: (1, 4C). w2: (4C, C). b2: (1, C).

    Weights are pre-transposed relative to PyTorch nn.Linear storage, i.e. this
    computes  relu(x @ w1 + b1) @ w2 + b2  (== the module's forward at p=0.0).
    `row_block` counts FOLDED rows (one folded row == two logical rows).
    """
    B, T, C = x.shape
    assert C == N_EMBD
    M = B * T

    xf = x.reshape(M, C)
    if M % 2:  # need an even row count to fold pairs into 128-lane rows
        xf = jnp.pad(xf, ((0, 1), (0, 0)))   # single-row pad only; normally skipped
    Me = xf.shape[0]
    M2 = Me // 2
    xf2 = xf.reshape(M2, C2)                 # free, contiguous reshape

    # Block-diagonal weights / duplicated biases (tiny; VMEM-resident in-kernel).
    w1_bd = _block_diag2(w1)                 # (128, 512)
    w2_bd = _block_diag2(w2)                 # (512, 128)
    b1_d = jnp.concatenate([b1, b1], axis=1) # (1, 512)
    b2_d = jnp.concatenate([b2, b2], axis=1) # (1, 128)

    # Row tile: large (2048 folded rows) to amortize per-step overhead; shrunk
    # (multiple of 8) for small inputs.  When there is enough work, keep >= 2
    # grid steps so the "parallel" axis can occupy both v7x TensorCores.
    tm = min(row_block, _round_up(M2, 8))
    if M2 >= 512 and pl.cdiv(M2, tm) < 2:
        tm = _round_up(pl.cdiv(M2, 2), 8)

    grid = (pl.cdiv(M2, tm),)  # ragged last block: reads padded, stores masked

    out2 = pl.pallas_call(
        _ffwd_kernel,
        out_shape=jax.ShapeDtypeStruct((M2, C2), x.dtype),
        grid_spec=pltpu.PrefetchScalarGridSpec(
            num_scalar_prefetch=0,
            grid=grid,
            in_specs=[
                pl.BlockSpec((tm, C2), lambda i: (i, 0)),   # x rows (streamed)
                pl.BlockSpec((C2, H2), lambda i: (0, 0)),   # W1_bd (VMEM-resident)
                pl.BlockSpec((1, H2), lambda i: (0, 0)),    # b1
                pl.BlockSpec((H2, C2), lambda i: (0, 0)),   # W2_bd (VMEM-resident)
                pl.BlockSpec((1, C2), lambda i: (0, 0)),    # b2
            ],
            out_specs=pl.BlockSpec((tm, C2), lambda i: (i, 0)),
        ),
        compiler_params=pltpu.CompilerParams(
            dimension_semantics=("parallel",),
            vmem_limit_bytes=32 * 1024 * 1024,  # headroom over v5e's 16 MiB default
        ),
    )(xf2, w1_bd, b1_d, w2_bd, b2_d)

    out = out2.reshape(Me, C)
    if Me != M:
        out = out[:M]
    return out.reshape(B, T, C)


def _reference(x, w1, b1, w2, b2):
    """Pure-JAX reference replicating the PyTorch forward exactly."""
    h = jnp.maximum(x @ w1 + b1[0], 0.0)
    return h @ w2 + b2[0]


if __name__ == "__main__":
    key = jax.random.PRNGKey(0)
    kx, k1, kb1, k2, kb2 = jax.random.split(key, 5)

    B, T, C = 2, 8, N_EMBD
    x = jax.random.normal(kx, (B, T, C), dtype=jnp.float32)

    # PyTorch-Linear-style uniform init, bound = 1/sqrt(fan_in); weights stored
    # pre-transposed ((in, out)) so the kernel does plain x @ W.
    bound1 = 1.0 / (N_EMBD ** 0.5)
    bound2 = 1.0 / (HIDDEN ** 0.5)
    w1 = jax.random.uniform(k1, (C, HIDDEN), jnp.float32, -bound1, bound1)
    b1 = jax.random.uniform(kb1, (1, HIDDEN), jnp.float32, -bound1, bound1)
    w2 = jax.random.uniform(k2, (HIDDEN, C), jnp.float32, -bound2, bound2)
    b2 = jax.random.uniform(kb2, (1, C), jnp.float32, -bound2, bound2)

    # f32 path: matches the PyTorch module numerics (f32 accumulation throughout).
    out = jax.block_until_ready(feed_forward(x, w1, b1, w2, b2))
    ref = _reference(x, w1, b1, w2, b2)
    assert out.shape == (B, T, C)
    assert jnp.allclose(out, ref, atol=2e-4, rtol=2e-4), "f32 mismatch vs reference"

    # bf16 path: halves HBM traffic / doubles MXU rate; f32 accumulation kept.
    xb = x.astype(jnp.bfloat16)
    w1b, b1b = w1.astype(jnp.bfloat16), b1.astype(jnp.bfloat16)
    w2b, b2b = w2.astype(jnp.bfloat16), b2.astype(jnp.bfloat16)
    out_bf = jax.block_until_ready(feed_forward(xb, w1b, b1b, w2b, b2b))
    ref_bf = _reference(xb.astype(jnp.float32), w1b.astype(jnp.float32),
                        b1b.astype(jnp.float32), w2b.astype(jnp.float32),
                        b2b.astype(jnp.float32))
    assert out_bf.dtype == jnp.bfloat16
    assert jnp.allclose(out_bf.astype(jnp.float32), ref_bf, atol=3e-2, rtol=3e-2), \
        "bf16 mismatch vs reference"

    print("KERNEL_OK")
</pallas_src>

<mosaic_0001>
module attributes {stable_mosaic.version = 11 : i64} {
  func.func @_ffwd_kernel(%arg0: i32, %arg1: memref<8x128xf32, #tpu.memory_space<vmem>>, %arg2: memref<128x512xf32, #tpu.memory_space<vmem>>, %arg3: memref<1x512xf32, #tpu.memory_space<vmem>>, %arg4: memref<512x128xf32, #tpu.memory_space<vmem>>, %arg5: memref<1x128xf32, #tpu.memory_space<vmem>>, %arg6: memref<8x128xf32, #tpu.memory_space<vmem>>) attributes {dimension_semantics = [#tpu.dimension_semantics<parallel>], iteration_bounds = array<i64: 1>, scalar_prefetch = 0 : i64, scratch_operands = 0 : i64, tpu.core_type = #tpu.core_type<tc>, window_params = [{transform_indices = @transform_0, window_bounds = array<i64: 8, 128>}, {pipeline_mode = #tpu.pipeline_mode<synchronous>, transform_indices = @transform_1, window_bounds = array<i64: 128, 512>}, {pipeline_mode = #tpu.pipeline_mode<synchronous>, transform_indices = @transform_2, window_bounds = array<i64: 1, 512>}, {pipeline_mode = #tpu.pipeline_mode<synchronous>, transform_indices = @transform_3, window_bounds = array<i64: 512, 128>}, {pipeline_mode = #tpu.pipeline_mode<synchronous>, transform_indices = @transform_4, window_bounds = array<i64: 1, 128>}, {transform_indices = @transform_5, window_bounds = array<i64: 8, 128>}]} {
    %c0 = arith.constant 0 : index
    %c0_0 = arith.constant 0 : index
    %0 = vector.load %arg1[%c0, %c0_0] : memref<8x128xf32, #tpu.memory_space<vmem>>, vector<8x128xf32>
    %c0_1 = arith.constant 0 : index
    %c0_2 = arith.constant 0 : index
    %1 = vector.load %arg2[%c0_1, %c0_2] : memref<128x512xf32, #tpu.memory_space<vmem>>, vector<128x512xf32>
    %cst = arith.constant dense<0.000000e+00> : vector<8x512xf32>
    %2 = tpu.matmul %0, %1, %cst {dimension_numbers = #tpu.dot_dimension_numbers<[1], [0], [0], [1], [0, 0, 1, 1], [], []>} : vector<8x128xf32>, vector<128x512xf32>, vector<8x512xf32> -> vector<8x512xf32>
    %c0_3 = arith.constant 0 : index
    %c0_4 = arith.constant 0 : index
    %3 = vector.load %arg3[%c0_3, %c0_4] : memref<1x512xf32, #tpu.memory_space<vmem>>, vector<1x512xf32>
    %4 = vector.broadcast %3 : vector<1x512xf32> to vector<8x512xf32>
    %5 = arith.addf %2, %4 : vector<8x512xf32>
    %cst_5 = arith.constant 0.000000e+00 : f32
    %6 = vector.broadcast %cst_5 : f32 to vector<8x512xf32>
    %7 = arith.maximumf %5, %6 : vector<8x512xf32>
    %c0_6 = arith.constant 0 : index
    %c0_7 = arith.constant 0 : index
    %8 = vector.load %arg4[%c0_6, %c0_7] : memref<512x128xf32, #tpu.memory_space<vmem>>, vector<512x128xf32>
    %cst_8 = arith.constant dense<0.000000e+00> : vector<8x128xf32>
    %9 = tpu.matmul %7, %8, %cst_8 {dimension_numbers = #tpu.dot_dimension_numbers<[1], [0], [0], [1], [0, 0, 1, 1], [], []>} : vector<8x512xf32>, vector<512x128xf32>, vector<8x128xf32> -> vector<8x128xf32>
    %c0_9 = arith.constant 0 : index
    %c0_10 = arith.constant 0 : index
    %10 = vector.load %arg5[%c0_9, %c0_10] : memref<1x128xf32, #tpu.memory_space<vmem>>, vector<1x128xf32>
    %11 = vector.broadcast %10 : vector<1x128xf32> to vector<8x128xf32>
    %12 = arith.addf %9, %11 : vector<8x128xf32>
    %c0_11 = arith.constant 0 : index
    %c0_12 = arith.constant 0 : index
    %13 = vector.load %arg6[%c0_11, %c0_12] : memref<8x128xf32, #tpu.memory_space<vmem>>, vector<8x128xf32>
    tpu.vector_store %arg6[%c0_11, %c0_12], %12 {strides = array<i32>} : memref<8x128xf32, #tpu.memory_space<vmem>>, vector<8x128xf32>,
    return
  }
  func.func @transform_0(%arg0: i32) -> (i32, i32) {
    %c0_i32 = arith.constant 0 : i32
    %c0_i32_0 = arith.constant 0 : i32
    return %arg0, %c0_i32 : i32, i32
  }
  func.func @transform_1(%arg0: i32) -> (i32, i32) {
    %c0_i32 = arith.constant 0 : i32
    %c0_i32_0 = arith.constant 0 : i32
    %c0_i32_1 = arith.constant 0 : i32
    return %c0_i32, %c0_i32_0 : i32, i32
  }
  func.func @transform_2(%arg0: i32) -> (i32, i32) {
    %c0_i32 = arith.constant 0 : i32
    %c0_i32_0 = arith.constant 0 : i32
    %c0_i32_1 = arith.constant 0 : i32
    return %c0_i32, %c0_i32_0 : i32, i32
  }
  func.func @transform_3(%arg0: i32) -> (i32, i32) {
    %c0_i32 = arith.constant 0 : i32
    %c0_i32_0 = arith.constant 0 : i32
    %c0_i32_1 = arith.constant 0 : i32
    return %c0_i32, %c0_i32_0 : i32, i32
  }
  func.func @transform_4(%arg0: i32) -> (i32, i32) {
    %c0_i32 = arith.constant 0 : i32
    %c0_i32_0 = arith.constant 0 : i32
    %c0_i32_1 = arith.constant 0 : i32
    return %c0_i32, %c0_i32_0 : i32, i32
  }
  func.func @transform_5(%arg0: i32) -> (i32, i32) {
    %c0_i32 = arith.constant 0 : i32
    %c0_i32_0 = arith.constant 0 : i32
    return %arg0, %c0_i32 : i32, i32
  }
}

</mosaic_0001>

<bundles_post_ra>
// kernel: tpu_custom_call.1
= control target key start
LH: loop header
LB: loop body
LE: loop exit
PB: predicated region body
PF: predicated region fallthrough
CT: control target
= control target key end

     0   :  { %10 = vsyncpa [#allocation3], 0  ;;  %s916_s0 = inlined_call_operand.hbm [shape: f32[8,128], index: 0, kind: input, shape index: {}]   ;;  %s917_s1 = inlined_call_operand.hbm [shape: f32[128,512], index: 1, kind: input, shape index: {}]   ;;  %s918_s2 = inlined_call_operand.vmem [shape: f32[1,512], index: 2, kind: input, shape index: {}]   ;;  %s919_s3 = inlined_call_operand.hbm [shape: f32[512,128], index: 3, kind: input, shape index: {}]   ;;  %s920_s4 = inlined_call_operand.vmem [shape: f32[1,128], index: 4, kind: input, shape index: {}]   ;;  %s921_s5 = inlined_call_operand.hbm [shape: f32[8,128], index: 5, kind: output, shape index: {}]  }
   0x1   :  { %11 = vsyncpa [#allocation6], 0 }
   0x2   :  { %12 = vsyncpa [#allocation4], 0  ;;  %s823_s18 = smov [#allocation5]   ;;  %s729_s22 = scalar_lea.hbm %s917_s1, 8192 }
   0x3   :  { %s28_s19 = sshll.u32 %s823_s18, 4  ;;  %p730_p0 = scmp.ne.s32.totalorder %s917_s1, %s729_s22  ;;  %s29_s19 = int_to_ptr.vmem [resolvable:$true] %s28_s19 }
   0x4   :  { %p733_p1 = scmp.lt.u32.totalorder %s729_s22, %s917_s1 }
   0x6   :  { %p735_p2 = pnand %p733_p1, %p730_p0 }
   0x8   :  { %738 = shalt.err (!%p735_p2)
}
   0x9   :  { %s739_s27 = scalar_lea.vmem %s29_s19, 8192  ;;  %p744_p4 = scmp.lt.s32.totalorder %s29_s19, %s29_s19 }
   0xa   :  { %p740_p3 = scmp.ne.s32.totalorder %s29_s19, %s739_s27  ;;  %p745_p5 = scmp.lt.s32.totalorder %s739_s27, %s739_s27 }
   0xc   :  { %p746_p6 = por %p745_p5, %p744_p4 }
   0xe   :  { %p747_p7 = pnand %p746_p6, %p740_p3 }
  0x10   :  { %750 = shalt.err (!%p747_p7)
}
  0x11   :  { %s824_s28 = smov 512   ;;  %s825_s29 = smov 32  }
  0x12   :  { %34 = dma.hbm_to_vmem [thread:$0]  %s917_s1, 8192, %s29_s19, [#allocation6], %s824_s28, %s824_s28, %s825_s29  }
  0x13   :  { %s826_s7 = smov [#allocation2]   ;;  %s827_s9 = smov [#allocation7]  }
  0x14   :  { %s19_s8 = sshll.u32 %s826_s7, 4  ;;  %s42_s10 = sshll.u32 %s827_s9, 4  ;;  %s20_s8 = int_to_ptr.vmem [resolvable:$true] %s19_s8  ;;  %s43_s10 = int_to_ptr.vmem [resolvable:$true] %s42_s10 }
  0x15   :  { %s751_s13 = scalar_lea.hbm %s916_s0, 128 }
  0x16   :  { %p752_p8 = scmp.ne.s32.totalorder %s916_s0, %s751_s13  ;;  %p755_p9 = scmp.lt.u32.totalorder %s751_s13, %s916_s0 }
  0x18   :  { %p757_p10 = pnand %p755_p9, %p752_p8 }
  0x1a   :  { %760 = shalt.err (!%p757_p10)
}
  0x1b   :  { %s761_s1 = scalar_lea.vmem %s20_s8, 128  ;;  %p766_p12 = scmp.lt.s32.totalorder %s20_s8, %s20_s8 }
  0x1c   :  { %p762_p11 = scmp.ne.s32.totalorder %s20_s8, %s761_s1  ;;  %p767_p13 = scmp.lt.s32.totalorder %s761_s1, %s761_s1 }
  0x1e   :  { %p768_p0 = por %p767_p13, %p766_p12 }
  0x20   :  { %p769_p1 = pnand %p768_p0, %p762_p11 }
  0x22   :  { %772 = shalt.err (!%p769_p1)
}
  0x23   :  { %22 = dma.hbm_to_vmem [thread:$0]  %s916_s0, 128, %s20_s8, [#allocation3]  }
  0x24   :  { %s773_s22 = scalar_lea.hbm %s919_s3, 8192 }
  0x25   :  { %p774_p2 = scmp.ne.s32.totalorder %s919_s3, %s773_s22  ;;  %p777_p3 = scmp.lt.u32.totalorder %s773_s22, %s919_s3 }
  0x27   :  { %p779_p4 = pnand %p777_p3, %p774_p2 }
  0x29   :  { %782 = shalt.err (!%p779_p4)
}
  0x2a   :  { %s783_s27 = scalar_lea.vmem %s43_s10, 8192  ;;  %p788_p6 = scmp.lt.s32.totalorder %s43_s10, %s43_s10 }
  0x2b   :  { %p784_p5 = scmp.ne.s32.totalorder %s43_s10, %s783_s27  ;;  %p789_p7 = scmp.lt.s32.totalorder %s783_s27, %s783_s27 }
  0x2d   :  { %p790_p8 = por %p789_p7, %p788_p6 }
  0x2f   :  { %p791_p9 = pnand %p790_p8, %p784_p5 }
  0x31   :  { %794 = shalt.err (!%p791_p9)
}
  0x32   :  { %s828_s0 = smov 128   ;;  %s829_s28 = smov 8  }
  0x33   :  { %48 = dma.hbm_to_vmem [thread:$0]  %s919_s3, 8192, %s43_s10, [#allocation6], %s828_s0, %s828_s0, %s829_s28  }
  0x34   :  { %817 = dma.done.wait [#allocation3], 128  }
  0x35   :  { %818 = vsyncadd [#allocation3], 4294967168 }
  0x36   :  { %819 = dma.done.wait [#allocation6], 16384  }
  0x37   :  { %820 = vsyncadd [#allocation6], 4294950912  ;;  %v830_v0 = vmov 0.0   ;;  %v62_v1 = vld [vmem:[#allocation5 + $0x8] sm:$0xff]  ;;  %v64_v3 = vld [vmem:[#allocation5 + $0x18] sm:$0xff]  ;;  %s831_s8 = smov [#allocation8]  }
  0x38   :  { %211 = vmatprep.mubr.f32.mxu0 %v830_v0  ;;  %282 = vmatprep.mubr.f32.mxu1 %v830_v0  ;;  %v66_v2 = vld [vmem:[#allocation5 + $0x28] sm:$0xff]  ;;  %v68_v5 = vld [vmem:[#allocation5 + $0x38] sm:$0xff]  ;;  %v61_v6 = vld [vmem:[#allocation5] sm:$0xff]  ;;  %s511_s9 = sshll.u32 %s831_s8, 4  ;;  %s512_s9 = int_to_ptr.vmem [resolvable:$true] %s511_s9 }
  0x39   :  { %v592_v4 = vpack.c.bf16 %v66_v2, %v62_v1  ;;  %v65_v7 = vld [vmem:[#allocation5 + $0x20] sm:$0xff]  ;;  %v624_v8 = vpack.c.bf16 %v68_v5, %v64_v3  ;;  %v63_v10 = vld [vmem:[#allocation5 + $0x10] sm:$0xff]  ;;  %v70_v12 = vld [vmem:[#allocation5 + $0x48] sm:$0xff]  ;;  %s795_s10 = scalar_lea.vmem %s512_s9, 128  ;;  %p800_p11 = scmp.lt.s32.totalorder %s512_s9, %s512_s9 }
  0x3a   :  { %v594_v9 = vpack.c.bf16 %v65_v7, %v61_v6  ;;  %v67_v11 = vld [vmem:[#allocation5 + $0x30] sm:$0xff]  ;;  %v74_v14 = vld [vmem:[#allocation5 + $0x68] sm:$0xff]  ;;  %v72_v15 = vld [vmem:[#allocation5 + $0x58] sm:$0xff]  ;;  %p796_p10 = scmp.ne.s32.totalorder %s512_s9, %s795_s10  ;;  %p801_p12 = scmp.lt.s32.totalorder %s795_s10, %s795_s10 }
  0x3b   :  { %593 = vmatprep.subr.bf16.mxu0 %v592_v4  ;;  %v626_v13 = vpack.c.bf16 %v67_v11, %v63_v10  ;;  %v76_v16 = vld [vmem:[#allocation5 + $0x78] sm:$0xff]  ;;  %625 = vmatprep.subr.bf16.mxu1 %v624_v8  ;;  %v596_v17 = vpack.c.bf16 %v74_v14, %v70_v12  ;;  %v69_v19 = vld [vmem:[#allocation5 + $0x40] sm:$0xff]  ;;  %v71_v21 = vld [vmem:[#allocation5 + $0x50] sm:$0xff] }
  0x3c   :  { %595 = vmatpush1.bf16.msra.mxu0 %v594_v9  ;;  %v628_v18 = vpack.c.bf16 %v76_v16, %v72_v15  ;;  %v73_v20 = vld [vmem:[#allocation5 + $0x60] sm:$0xff]  ;;  %v75_v23 = vld [vmem:[#allocation5 + $0x70] sm:$0xff]  ;;  %v78_v24 = vld [vmem:[#allocation5 + $0x88] sm:$0xff]  ;;  %p802_p13 = por %p801_p12, %p800_p11 }
  0x3d   :  { %627 = vmatpush1.bf16.msra.mxu1 %v626_v13  ;;  %v598_v22 = vpack.c.bf16 %v73_v20, %v69_v19  ;;  %v82_v25 = vld [vmem:[#allocation5 + $0xa8] sm:$0xff]  ;;  %597 = vmatprep.subr.bf16.mxu0 %v596_v17  ;;  %v630_v26 = vpack.c.bf16 %v75_v23, %v71_v21  ;;  %v80_v28 = vld [vmem:[#allocation5 + $0x98] sm:$0xff]  ;;  %v77_v30 = vld [vmem:[#allocation5 + $0x80] sm:$0xff] }
  0x3e   :  { %629 = vmatprep.subr.bf16.mxu1 %v628_v18  ;;  %v600_v27 = vpack.c.bf16 %v82_v25, %v78_v24  ;;  %v84_v29 = vld [vmem:[#allocation5 + $0xb8] sm:$0xff]  ;;  %v81_v32 = vld [vmem:[#allocation5 + $0xa0] sm:$0xff]  ;;  %v79_v33 = vld [vmem:[#allocation5 + $0x90] sm:$0xff]  ;;  %p803_p0 = pnand %p802_p13, %p796_p10 }
  0x3f   :  { %v632_v31 = vpack.c.bf16 %v84_v29, %v80_v28  ;;  %v83_v34 = vld [vmem:[#allocation5 + $0xb0] sm:$0xff]  ;;  %v602_v35 = vpack.c.bf16 %v81_v32, %v77_v30  ;;  %v86_v36 = vld [vmem:[#allocation5 + $0xc8] sm:$0xff]  ;;  %v88_v38 = vld [vmem:[#allocation5 + $0xd8] sm:$0xff] }
  0x40   :  { %599 = vmatpush1.bf16.msra.mxu0 %v598_v22  ;;  %v90_v37 = vld [vmem:[#allocation5 + $0xe8] sm:$0xff]  ;;  %v634_v39 = vpack.c.bf16 %v83_v34, %v79_v33  ;;  %v92_v41 = vld [vmem:[#allocation5 + $0xf8] sm:$0xff]  ;;  %v85_v42 = vld [vmem:[#allocation5 + $0xc0] sm:$0xff] }
  0x41   :  { %631 = vmatpush1.bf16.msra.mxu1 %v630_v26  ;;  %601 = vmatprep.subr.bf16.mxu0 %v600_v27  ;;  %v604_v40 = vpack.c.bf16 %v90_v37, %v86_v36  ;;  %v89_v43 = vld [vmem:[#allocation5 + $0xe0] sm:$0xff]  ;;  %v636_v44 = vpack.c.bf16 %v92_v41, %v88_v38  ;;  %v87_v45 = vld [vmem:[#allocation5 + $0xd0] sm:$0xff]  ;;  %v94_v47 = vld [vmem:[#allocation5 + $0x108] sm:$0xff] }
  0x42   :  { %633 = vmatprep.subr.bf16.mxu1 %v632_v31  ;;  %v91_v46 = vld [vmem:[#allocation5 + $0xf0] sm:$0xff]  ;;  %v98_v48 = vld [vmem:[#allocation5 + $0x128] sm:$0xff]  ;;  %v96_v49 = vld [vmem:[#allocation5 + $0x118] sm:$0xff]  ;;  %v606_v51 = vpack.c.bf16 %v89_v43, %v85_v42 }
  0x43   :  { %v100_v50 = vld [vmem:[#allocation5 + $0x138] sm:$0xff]  ;;  %v638_v52 = vpack.c.bf16 %v91_v46, %v87_v45  ;;  %v608_v53 = vpack.c.bf16 %v98_v48, %v94_v47  ;;  %v93_v54 = vld [vmem:[#allocation5 + $0x100] sm:$0xff]  ;;  %v95_v56 = vld [vmem:[#allocation5 + $0x110] sm:$0xff] }
  0x44   :  { %603 = vmatpush1.bf16.msra.mxu0 %v602_v35  ;;  %v97_v55 = vld [vmem:[#allocation5 + $0x120] sm:$0xff]  ;;  %v640_v57 = vpack.c.bf16 %v100_v50, %v96_v49  ;;  %v99_v58 = vld [vmem:[#allocation5 + $0x130] sm:$0xff]  ;;  %v102_v59 = vld [vmem:[#allocation5 + $0x148] sm:$0xff] }
  0x45   :  { %635 = vmatpush1.bf16.msra.mxu1 %v634_v39  ;;  %605 = vmatprep.subr.bf16.mxu0 %v604_v40  ;;  %v106_v60 = vld [vmem:[#allocation5 + $0x168] sm:$0xff]  ;;  %v104_v61 = vld [vmem:[#allocation5 + $0x158] sm:$0xff]  ;;  %v610_v63 = vpack.c.bf16 %v97_v55, %v93_v54  ;;  %v642_v0 = vpack.c.bf16 %v99_v58, %v95_v56  ;;  %v101_v2 = vld [vmem:[#allocation5 + $0x140] sm:$0xff] }
  0x46   :  { %637 = vmatprep.subr.bf16.mxu1 %v636_v44  ;;  %v108_v62 = vld [vmem:[#allocation5 + $0x178] sm:$0xff]  ;;  %v612_v1 = vpack.c.bf16 %v106_v60, %v102_v59  ;;  %v105_v3 = vld [vmem:[#allocation5 + $0x160] sm:$0xff]  ;;  %v103_v4 = vld [vmem:[#allocation5 + $0x150] sm:$0xff] }
  0x47   :  { %v644_v5 = vpack.c.bf16 %v108_v62, %v104_v61  ;;  %v107_v6 = vld [vmem:[#allocation5 + $0x170] sm:$0xff]  ;;  %v110_v7 = vld [vmem:[#allocation5 + $0x188] sm:$0xff]  ;;  %v112_v9 = vld [vmem:[#allocation5 + $0x198] sm:$0xff]  ;;  %v614_v11 = vpack.c.bf16 %v105_v3, %v101_v2 }
  0x48   :  { %607 = vmatpush1.bf16.msra.mxu0 %v606_v51  ;;  %v114_v8 = vld [vmem:[#allocation5 + $0x1a8] sm:$0xff]  ;;  %v116_v10 = vld [vmem:[#allocation5 + $0x1b8] sm:$0xff]  ;;  %v646_v12 = vpack.c.bf16 %v107_v6, %v103_v4  ;;  %v109_v14 = vld [vmem:[#allocation5 + $0x180] sm:$0xff] }
  0x49   :  { %639 = vmatpush1.bf16.msra.mxu1 %v638_v52  ;;  %609 = vmatprep.subr.bf16.mxu0 %v608_v53  ;;  %v616_v13 = vpack.c.bf16 %v114_v8, %v110_v7  ;;  %v113_v15 = vld [vmem:[#allocation5 + $0x1a0] sm:$0xff]  ;;  %v111_v16 = vld [vmem:[#allocation5 + $0x190] sm:$0xff]  ;;  %v648_v17 = vpack.c.bf16 %v116_v10, %v112_v9  ;;  %v118_v19 = vld [vmem:[#allocation5 + $0x1c8] sm:$0xff] }
  0x4a   :  { %641 = vmatprep.subr.bf16.mxu1 %v640_v57  ;;  %v115_v18 = vld [vmem:[#allocation5 + $0x1b0] sm:$0xff]  ;;  %v122_v20 = vld [vmem:[#allocation5 + $0x1e8] sm:$0xff]  ;;  %v120_v21 = vld [vmem:[#allocation5 + $0x1d8] sm:$0xff]  ;;  %v618_v23 = vpack.c.bf16 %v113_v15, %v109_v14 }
  0x4b   :  { %v124_v22 = vld [vmem:[#allocation5 + $0x1f8] sm:$0xff]  ;;  %v650_v24 = vpack.c.bf16 %v115_v18, %v111_v16  ;;  %v620_v25 = vpack.c.bf16 %v122_v20, %v118_v19  ;;  %v117_v26 = vld [vmem:[#allocation5 + $0x1c0] sm:$0xff]  ;;  %v119_v28 = vld [vmem:[#allocation5 + $0x1d0] sm:$0xff] }
  0x4c   :  { %611 = vmatpush1.bf16.msra.mxu0 %v610_v63  ;;  %v121_v27 = vld [vmem:[#allocation5 + $0x1e0] sm:$0xff]  ;;  %v652_v29 = vpack.c.bf16 %v124_v22, %v120_v21  ;;  %v123_v30 = vld [vmem:[#allocation5 + $0x1f0] sm:$0xff]  ;;  %v310_v32 = vld [vmem:[#allocation7 + $0x88] sm:$0xff] }
  0x4d   :  { %643 = vmatpush1.bf16.msra.mxu1 %v642_v0  ;;  %613 = vmatprep.subr.bf16.mxu0 %v612_v1  ;;  %v309_v31 = vld [vmem:[#allocation7 + $0x80] sm:$0xff]  ;;  %v342_v34 = vld [vmem:[#allocation7 + $0x188] sm:$0xff]  ;;  %v622_v35 = vpack.c.bf16 %v121_v27, %v117_v26  ;;  %v654_v36 = vpack.c.bf16 %v123_v30, %v119_v28  ;;  %v311_v43 = vld [vmem:[#allocation7 + $0x90] sm:$0xff] }
  0x4e   :  { %645 = vmatprep.subr.bf16.mxu1 %v644_v5  ;;  %v341_v33 = vld [vmem:[#allocation7 + $0x180] sm:$0xff]  ;;  %v656_v37 = vpack.c.bf16 %v310_v32, %v309_v31  ;;  %v294_v39 = vld [vmem:[#allocation7 + $0x8] sm:$0xff]  ;;  %v312_v44 = vld [vmem:[#allocation7 + $0x98] sm:$0xff] }
  0x4f   :  { %v293_v38 = vld [vmem:[#allocation7] sm:$0xff]  ;;  %v688_v41 = vpack.c.bf16 %v342_v34, %v341_v33  ;;  %v326_v42 = vld [vmem:[#allocation7 + $0x108] sm:$0xff]  ;;  %v343_v45 = vld [vmem:[#allocation7 + $0x190] sm:$0xff]  ;;  %v660_v50 = vpack.c.bf16 %v312_v44, %v311_v43 }
  0x50   :  { %615 = vmatpush1.bf16.msra.mxu0 %v614_v11  ;;  %v325_v40 = vld [vmem:[#allocation7 + $0x100] sm:$0xff]  ;;  %v344_v46 = vld [vmem:[#allocation7 + $0x198] sm:$0xff]  ;;  %v658_v48 = vpack.c.bf16 %v294_v39, %v293_v38  ;;  %v295_v51 = vld [vmem:[#allocation7 + $0x10] sm:$0xff] }
  0x51   :  { %647 = vmatpush1.bf16.msra.mxu1 %v646_v12  ;;  %617 = vmatprep.subr.bf16.mxu0 %v616_v13  ;;  %v60_v47 = vld [vmem:[#allocation2] sm:$0xff]  ;;  %v690_v49 = vpack.c.bf16 %v326_v42, %v325_v40  ;;  %v327_v53 = vld [vmem:[#allocation7 + $0x110] sm:$0xff]  ;;  %v692_v54 = vpack.c.bf16 %v344_v46, %v343_v45  ;;  %v313_v56 = vld [vmem:[#allocation7 + $0xa0] sm:$0xff] }
  0x52   :  { %649 = vmatprep.subr.bf16.mxu1 %v648_v17  ;;  %v296_v52 = vld [vmem:[#allocation7 + $0x18] sm:$0xff]  ;;  %v314_v57 = vld [vmem:[#allocation7 + $0xa8] sm:$0xff]  ;;  %v345_v58 = vld [vmem:[#allocation7 + $0x1a0] sm:$0xff] }
  0x53   :  { %v328_v55 = vld [vmem:[#allocation7 + $0x118] sm:$0xff]  ;;  %v346_v59 = vld [vmem:[#allocation7 + $0x1a8] sm:$0xff]  ;;  %v662_v60 = vpack.c.bf16 %v296_v52, %v295_v51  ;;  %v664_v62 = vpack.c.bf16 %v314_v57, %v313_v56  ;;  %v297_v63 = vld [vmem:[#allocation7 + $0x20] sm:$0xff] }
  0x54   :  { %619 = vmatpush1.bf16.msra.mxu0 %v618_v23  ;;  %v694_v61 = vpack.c.bf16 %v328_v55, %v327_v53  ;;  %v298_v0 = vld [vmem:[#allocation7 + $0x28] sm:$0xff]  ;;  %v329_v1 = vld [vmem:[#allocation7 + $0x120] sm:$0xff]  ;;  %v696_v2 = vpack.c.bf16 %v346_v59, %v345_v58  ;;  %v315_v4 = vld [vmem:[#allocation7 + $0xb0] sm:$0xff] }
  0x55   :  { %651 = vmatpush1.bf16.msra.mxu1 %v650_v24  ;;  %621 = vmatprep.subr.bf16.mxu0 %v620_v25  ;;  %v330_v3 = vld [vmem:[#allocation7 + $0x128] sm:$0xff]  ;;  %v316_v5 = vld [vmem:[#allocation7 + $0xb8] sm:$0xff]  ;;  %v347_v6 = vld [vmem:[#allocation7 + $0x1b0] sm:$0xff]  ;;  %v666_v8 = vpack.c.bf16 %v298_v0, %v297_v63 }
  0x56   :  { %653 = vmatprep.subr.bf16.mxu1 %v652_v29  ;;  %v348_v7 = vld [vmem:[#allocation7 + $0x1b8] sm:$0xff]  ;;  %v698_v9 = vpack.c.bf16 %v330_v3, %v329_v1  ;;  %v668_v10 = vpack.c.bf16 %v316_v5, %v315_v4  ;;  %v299_v11 = vld [vmem:[#allocation7 + $0x30] sm:$0xff]  ;;  %v317_v16 = vld [vmem:[#allocation7 + $0xc0] sm:$0xff] }
  0x57   :  { %v300_v12 = vld [vmem:[#allocation7 + $0x38] sm:$0xff]  ;;  %v331_v13 = vld [vmem:[#allocation7 + $0x130] sm:$0xff]  ;;  %v700_v14 = vpack.c.bf16 %v348_v7, %v347_v6  ;;  %v318_v17 = vld [vmem:[#allocation7 + $0xc8] sm:$0xff] }
  0x58   :  { %623 = vmatpush1.bf16.msra.mxu0 %v622_v35  ;;  %v332_v15 = vld [vmem:[#allocation7 + $0x138] sm:$0xff]  ;;  %v349_v18 = vld [vmem:[#allocation7 + $0x1c0] sm:$0xff]  ;;  %v350_v19 = vld [vmem:[#allocation7 + $0x1c8] sm:$0xff]  ;;  %v670_v20 = vpack.c.bf16 %v300_v12, %v299_v11  ;;  %v672_v22 = vpack.c.bf16 %v318_v17, %v317_v16 }
  0x59   :  { %655 = vmatpush1.bf16.msra.mxu1 %v654_v36  ;;  %657 = vmatprep.subr.bf16.mxu0 %v656_v37  ;;  %v702_v21 = vpack.c.bf16 %v332_v15, %v331_v13  ;;  %v301_v23 = vld [vmem:[#allocation7 + $0x40] sm:$0xff]  ;;  %v302_v24 = vld [vmem:[#allocation7 + $0x48] sm:$0xff]  ;;  %v704_v26 = vpack.c.bf16 %v350_v19, %v349_v18  ;;  %v319_v28 = vld [vmem:[#allocation7 + $0xd0] sm:$0xff] }
  0x5a   :  { %689 = vmatprep.subr.bf16.mxu1 %v688_v41  ;;  %v333_v25 = vld [vmem:[#allocation7 + $0x140] sm:$0xff]  ;;  %v334_v27 = vld [vmem:[#allocation7 + $0x148] sm:$0xff]  ;;  %v320_v29 = vld [vmem:[#allocation7 + $0xd8] sm:$0xff]  ;;  %v674_v32 = vpack.c.bf16 %v302_v24, %v301_v23 }
  0x5b   :  { %212 = vmatmul.mubr.f32.vlgmr.msra.gmra.mrb[0].mxu0 %v60_v47  ;;  %v351_v30 = vld [vmem:[#allocation7 + $0x1d0] sm:$0xff]  ;;  %v352_v31 = vld [vmem:[#allocation7 + $0x1d8] sm:$0xff]  ;;  %v706_v33 = vpack.c.bf16 %v334_v27, %v333_v25  ;;  %v676_v34 = vpack.c.bf16 %v320_v29, %v319_v28  ;;  %v321_v40 = vld [vmem:[#allocation7 + $0xe0] sm:$0xff] }
  0x5c   :  { %283 = vmatmul.mubr.f32.vlgmr.msra.gmra.mrb[0].mxu1 %v60_v47  ;;  %659 = vmatpush3.bf16.msra.mxu0 %v658_v48  ;;  %v303_v35 = vld [vmem:[#allocation7 + $0x50] sm:$0xff]  ;;  %v304_v36 = vld [vmem:[#allocation7 + $0x58] sm:$0xff]  ;;  %v708_v38 = vpack.c.bf16 %v352_v31, %v351_v30  ;;  %v322_v41 = vld [vmem:[#allocation7 + $0xe8] sm:$0xff] }
  0x5d   :  { %691 = vmatpush3.bf16.msra.mxu1 %v690_v49  ;;  %661 = vmatprep.subr.bf16.mxu0 %v660_v50  ;;  %v335_v37 = vld [vmem:[#allocation7 + $0x150] sm:$0xff]  ;;  %v336_v39 = vld [vmem:[#allocation7 + $0x158] sm:$0xff]  ;;  %v353_v42 = vld [vmem:[#allocation7 + $0x1e0] sm:$0xff]  ;;  %v678_v44 = vpack.c.bf16 %v304_v36, %v303_v35  ;;  %v680_v46 = vpack.c.bf16 %v322_v41, %v321_v40 }
  0x5e   :  { %693 = vmatprep.subr.bf16.mxu1 %v692_v54  ;;  %v354_v43 = vld [vmem:[#allocation7 + $0x1e8] sm:$0xff]  ;;  %v710_v45 = vpack.c.bf16 %v336_v39, %v335_v37  ;;  %v305_v48 = vld [vmem:[#allocation7 + $0x60] sm:$0xff]  ;;  %v323_v54 = vld [vmem:[#allocation7 + $0xf0] sm:$0xff] }
  0x5f   :  { %v712_v47 = vpack.c.bf16 %v354_v43, %v353_v42  ;;  %v306_v49 = vld [vmem:[#allocation7 + $0x68] sm:$0xff]  ;;  %v337_v50 = vld [vmem:[#allocation7 + $0x160] sm:$0xff]  ;;  %v324_v55 = vld [vmem:[#allocation7 + $0xf8] sm:$0xff] }
  0x60   :  { %663 = vmatpush3.bf16.msra.mxu0 %v662_v60  ;;  %v682_v51 = vpack.c.bf16 %v306_v49, %v305_v48  ;;  %v338_v52 = vld [vmem:[#allocation7 + $0x168] sm:$0xff]  ;;  %v355_v56 = vld [vmem:[#allocation7 + $0x1f0] sm:$0xff]  ;;  %v684_v57 = vpack.c.bf16 %v324_v55, %v323_v54  ;;  %v356_v58 = vld [vmem:[#allocation7 + $0x1f8] sm:$0xff] }
  0x61   :  { %695 = vmatpush3.bf16.msra.mxu1 %v694_v61  ;;  %665 = vmatprep.subr.bf16.mxu0 %v664_v62  ;;  %v714_v53 = vpack.c.bf16 %v338_v52, %v337_v50  ;;  %v307_v59 = vld [vmem:[#allocation7 + $0x70] sm:$0xff]  ;;  %v308_v60 = vld [vmem:[#allocation7 + $0x78] sm:$0xff]  ;;  %v716_v61 = vpack.c.bf16 %v356_v58, %v355_v56 }
  0x62   :  { %697 = vmatprep.subr.bf16.mxu1 %v696_v2  ;;  %v686_v62 = vpack.c.bf16 %v308_v60, %v307_v59  ;;  %v339_v63 = vld [vmem:[#allocation7 + $0x170] sm:$0xff]  ;;  %v340_v0 = vld [vmem:[#allocation7 + $0x178] sm:$0xff]  ;;  %v127_v2 = vlaneseq }
  0x63   :  { %v718_v1 = vpack.c.bf16 %v340_v0, %v339_v63  ;;  %v125_v5 = vld [vmem:[%s918_s2] sm:$0xf] }
  0x64   :  { %667 = vmatpush3.bf16.msra.mxu0 %v666_v8  ;;  %v128_v3 = vshrl.u32 %v127_v2, 7  ;;  %v521_v27 = vld [vmem:[%s920_s4] ss:$0 sm:$0xff] }
  0x65   :  { %699 = vmatpush3.bf16.msra.mxu1 %v698_v9  ;;  %669 = vmatprep.subr.bf16.mxu0 %v668_v10 }
  0x66   :  { %701 = vmatprep.subr.bf16.mxu1 %v700_v14  ;;  %v129_v4 = vsub.s32 0, %v128_v3  ;;  %v137_v6 = vsub.s32 2, %v128_v3  ;;  %v133_v7 = vsub.s32 1, %v128_v3  ;;  %v141_v8 = vsub.s32 3, %v128_v3 }
  0x68   :  { %671 = vmatpush3.bf16.msra.mxu0 %v670_v20  ;;  %v130_v9 = vrot.slane %v125_v5, %v129_v4  ;;  %v138_v10 = vrot.slane %v125_v5, %v137_v6  ;;  %v134_v11 = vrot.slane %v125_v5, %v133_v7  ;;  %v142_v12 = vrot.slane %v125_v5, %v141_v8 }
  0x69   :  { %703 = vmatpush3.bf16.msra.mxu1 %v702_v21  ;;  %673 = vmatprep.subr.bf16.mxu0 %v672_v22 }
  0x6a   :  { %705 = vmatprep.subr.bf16.mxu1 %v704_v26 }
  0x6c   :  { %675 = vmatpush3.bf16.msra.mxu0 %v674_v32 }
  0x6d   :  { %707 = vmatpush3.bf16.msra.mxu1 %v706_v33  ;;  %677 = vmatprep.subr.bf16.mxu0 %v676_v34 }
  0x6e   :  { %709 = vmatprep.subr.bf16.mxu1 %v708_v38 }
  0x70   :  { %679 = vmatpush3.bf16.msra.mxu0 %v678_v44 }
  0x71   :  { %711 = vmatpush3.bf16.msra.mxu1 %v710_v45  ;;  %681 = vmatprep.subr.bf16.mxu0 %v680_v46 }
  0x72   :  { %713 = vmatprep.subr.bf16.mxu1 %v712_v47 }
  0x74   :  { %683 = vmatpush3.bf16.msra.mxu0 %v682_v51 }
  0x75   :  { %715 = vmatpush3.bf16.msra.mxu1 %v714_v53  ;;  %685 = vmatprep.subr.bf16.mxu0 %v684_v57 }
  0x76   :  { %717 = vmatprep.subr.bf16.mxu1 %v716_v61 }
  0x78   :  { %687 = vmatpush3.bf16.msra.mxu0 %v686_v62 }
  0x79   :  { %719 = vmatpush3.bf16.msra.mxu1 %v718_v1 }
 0x12e   :  { %v213_v13 = vpop.f32.mrb[0].mxu0 }
 0x12f   :  { %v214_v14 = vadd.f32 %v213_v13, %v130_v9  ;;  %v284_v15 = vpop.f32.mrb[0].mxu1  ;;  %v215_v16 = vpop.f32.mrb[1].mxu0 }
 0x130   :  { %v285_v17 = vadd.f32 %v284_v15, %v138_v10  ;;  %v216_v18 = vadd.f32 %v215_v16, %v134_v11  ;;  %v286_v19 = vpop.f32.mrb[1].mxu1 }
 0x131   :  { %v287_v20 = vadd.f32 %v286_v19, %v142_v12  ;;  %v289_v23 = vmax.f32 %v214_v14, 0.0 }
 0x132   :  { %v291_v21 = vmax.f32 %v285_v17, 0.0  ;;  %v290_v22 = vmax.f32 %v216_v18, 0.0 }
 0x133   :  { %v292_v24 = vmax.f32 %v287_v20, 0.0 }
 0x134   :  { %428 = vmatprep.mubr.f32.mxu0 %v290_v22 }
 0x135   :  { %498 = vmatprep.mubr.f32.mxu1 %v292_v24  ;;  %429 = vmatmul.mubr.f32.vlgmr.msra.gmra.mrb[2].mxu0 %v289_v23 }
 0x136   :  { %499 = vmatmul.mubr.f32.vlgmr.msra.gmra.mrb[2].mxu1 %v291_v21 }
 0x208   :  { %v554_v25 = vpop.f32.mrb[2].mxu0 }
 0x209   :  { %v589_v26 = vpop.f32.mrb[2].mxu1  ;;  %v555_v28 = vpop.f32.mrb[3].mxu0 }
 0x20a   :  { %v556_v29 = vadd.f32 %v555_v28, %v554_v25  ;;  %v590_v30 = vpop.f32.mrb[3].mxu1 }
 0x20b   :  { %v591_v31 = vadd.f32 %v590_v30, %v589_v26 }
 0x20c   :  { %v431_v32 = vadd.f32 %v556_v29, %v521_v27 }
 0x20e   :  { %v501_v33 = vadd.f32 %v591_v31, %v431_v32 }
 0x210   :  { %504 = vst [vmem:[#allocation8] sm:$0xff] %v501_v33 }
 0x211   :  { %806 = shalt.err (!%p803_p0)
}
 0x212   :  { %s807_s4 = scalar_lea.hbm %s921_s5, 128 }
 0x213   :  { %p808_p1 = scmp.ne.s32.totalorder %s921_s5, %s807_s4  ;;  %p811_p2 = scmp.lt.u32.totalorder %s807_s4, %s921_s5 }
 0x215   :  { %p813_p3 = pnand %p811_p2, %p808_p1 }
 0x217   :  { %816 = shalt.err (!%p813_p3)
}
 0x218   :  { %514 = dma.vmem_to_hbm [thread:$0]  %s512_s9, 128, %s921_s5, [#allocation4]  }
 0x219   :  { %821 = dma.done.wait [#allocation4], 128  }
 0x21a   :  { %822 = vsyncadd [#allocation4], 4294967168 }
 0x21b   :  { %518 = vsyncpa [#allocation3], 1 }
 0x21c   :  { %519 = vsyncpa [#allocation6], 1 }
 0x21d   :  { %520 = vsyncpa [#allocation4], 1 }

</bundles_post_ra>
